<compile_context>
chip_gen: v5e
topology: v5e:2x2
jax: 0.10.0
libtpu: 0.0.40
codegen_flags: <defaults>
</compile_context>

<pallas_src>
import functools

import jax
import jax.numpy as jnp
from jax import lax
from jax.experimental import pallas as pl
from jax.experimental.pallas import tpu as pltpu

SCALE = 5.0          # scale arg of CycleConsistencyLoss
MARGIN = 0.2         # margin arg
CYCLE_WEIGHT = 0.5   # config['weights']['cycle'] (synthetic, deterministic)
COS_EPS = 1e-8       # F.cosine_similarity default eps
DEN_EPS = 1e-6       # epsilon in the loss denominator

# VMEM budget for the double-buffered streamed operands (x tile + w tile).
# 24 MiB keeps the kernel inside v7x's 32 MiB scoped default / 64 MiB physical
# VMEM and inside the explicit 32 MiB limit we request (which also raises
# v5e's 16 MiB scoped default).
_VMEM_TILE_BUDGET = 24 * 1024 * 1024
_VMEM_LIMIT_BYTES = 32 * 1024 * 1024


def _cycle_kernel(x_ref, w_ref, b_ref, out_ref, acc_ref, *, batch):
    k = pl.program_id(0)

    # ---- init accumulator on the first K tile -----------------------------
    @pl.when(k == 0)
    def _():
        acc_ref[...] = jnp.zeros_like(acc_ref)

    # ---- steady state: one (4B, tk) x (tk, D) MXU matmul, f32 accumulate --
    acc_ref[...] += jnp.dot(x_ref[...], w_ref[...],
                            preferred_element_type=jnp.float32)

    # ---- epilogue: bias + cosine / exp / log loss, once, on (4B, D) --------
    @pl.when(k == pl.num_programs(0) - 1)
    def _():
        z = acc_ref[...] + b_ref[...].astype(jnp.float32)        # (4B, D)
        zd = z[0 * batch:1 * batch, :]      # emodel(Xd)
        zdp = z[1 * batch:2 * batch, :]     # emodel(Xd_prime)
        zsd = z[2 * batch:3 * batch, :]     # emodel(gsd)
        zspd = z[3 * batch:4 * batch, :]    # emodel(gspd)

        def cos_dist(a, c):
            # cosine similarity with F.cosine_similarity's eps clamp:
            #   dot / (max(|a|, eps) * max(|c|, eps))
            # expressed with a single rsqrt (EUP) instead of sqrt + divide.
            dot = jnp.sum(a * c, axis=-1, keepdims=True)
            ssa = jnp.sum(a * a, axis=-1, keepdims=True)
            ssc = jnp.sum(c * c, axis=-1, keepdims=True)
            inv = lax.rsqrt(jnp.maximum(ssa, COS_EPS * COS_EPS)
                            * jnp.maximum(ssc, COS_EPS * COS_EPS))
            return jnp.exp(SCALE * (dot * inv - MARGIN))          # (B, 1)

        # neg_distances = sum(exp(stack([cd(zsd,zdp), cd(zspd,zdp)])))
        # (double exponential kept exactly as in the PyTorch spec)
        neg = (jnp.sum(jnp.exp(cos_dist(zsd, zdp)))
               + jnp.sum(jnp.exp(cos_dist(zspd, zdp))))

        d1 = cos_dist(zsd, zd)                                    # (B, 1)
        d2 = cos_dist(zspd, zd)                                    # (B, 1)
        loss = (-jnp.log(d1 / (d1 + neg + DEN_EPS))
                - jnp.log(d2 / (d2 + neg + DEN_EPS)))              # (B, 1)

        out_ref[...] = (jnp.sum(loss, axis=(0, 1), keepdims=True)
                        * (CYCLE_WEIGHT / batch))


def _pick_tk(feat, batch, emb, itemsize):
    """VMEM-budgeted K tile; collapses to a single grid step when F fits."""
    per_k_bytes = 2 * (4 * batch + emb) * itemsize   # double-buffered x + w
    tk_max = max(128, _VMEM_TILE_BUDGET // per_k_bytes)
    if feat <= tk_max:
        return feat                                   # single step, no RMW
    tk_max = (tk_max // 128) * 128
    for tk in range(tk_max, 127, -128):
        if feat % tk == 0:
            return tk
    return feat  # irregular F: single (large) block as a last resort


def cycle_consistency_loss(Xd, Xd_prime, gsd, gspd, enc_w, enc_b, *, tk=None):
    """Full forward of CycleConsistencyLoss with a linear `emodel`."""
    B = Xd.shape[0]
    F_in, D = enc_w.shape
    assert Xd.size == B * F_in, "feature dim of enc_w must match C*H*W"

    # One-time host stack of the four activations into a single (4B, F) LHS:
    # one activation DMA per grid step instead of four small strided ones, and
    # no per-step concatenate inside the kernel. (~16 KB copy at test shape.)
    x = jnp.concatenate(
        [Xd.reshape(B, F_in), Xd_prime.reshape(B, F_in),
         gsd.reshape(B, F_in), gspd.reshape(B, F_in)], axis=0)

    if tk is None:
        tk = _pick_tk(F_in, B, D, x.dtype.itemsize)
    assert F_in % tk == 0, (F_in, tk)
    grid = (F_in // tk,)

    cost = pl.CostEstimate(
        flops=2 * 4 * B * F_in * D,
        transcendentals=10 * B,
        bytes_accessed=(4 * B * F_in + F_in * D) * x.dtype.itemsize
        + 4 * D + 4,
    )

    out = pl.pallas_call(
        functools.partial(_cycle_kernel, batch=B),
        out_shape=jax.ShapeDtypeStruct((1, 1), jnp.float32),
        grid_spec=pltpu.PrefetchScalarGridSpec(
            num_scalar_prefetch=0,
            grid=grid,
            in_specs=[pl.BlockSpec((4 * B, tk), lambda k: (0, k)),
                      pl.BlockSpec((tk, D), lambda k: (k, 0)),
                      pl.BlockSpec((1, D), lambda k: (0, 0))],
            out_specs=pl.BlockSpec((1, 1), lambda k: (0, 0)),
            scratch_shapes=[pltpu.VMEM((4 * B, D), jnp.float32)],
        ),
        compiler_params=pltpu.CompilerParams(
            dimension_semantics=("arbitrary",),     # K is a reduction axis
            vmem_limit_bytes=_VMEM_LIMIT_BYTES,
        ),
        cost_estimate=cost,
    )(x, enc_w, enc_b.reshape(1, D).astype(jnp.float32))
    return out[0, 0]


def _reference_loss(Xd, Xd_prime, gsd, gspd, enc_w, enc_b):
    """Pure-JAX reference mirroring the PyTorch forward (f32 math)."""
    B = Xd.shape[0]
    w = enc_w.astype(jnp.float32)
    b = enc_b.astype(jnp.float32)

    def enc(x):
        return x.reshape(B, -1).astype(jnp.float32) @ w + b

    zd, zdp, zsd, zspd = enc(Xd), enc(Xd_prime), enc(gsd), enc(gspd)

    def cos(a, c):
        na = jnp.maximum(jnp.linalg.norm(a, axis=-1), COS_EPS)
        nc = jnp.maximum(jnp.linalg.norm(c, axis=-1), COS_EPS)
        return jnp.sum(a * c, axis=-1) / (na * nc)

    def cd(a, c):
        return jnp.exp(SCALE * (cos(a, c) - MARGIN))

    neg = jnp.sum(jnp.exp(jnp.stack([cd(zsd, zdp), cd(zspd, zdp)])))
    d1, d2 = cd(zsd, zd), cd(zspd, zd)
    loss = (-jnp.log(d1 / (d1 + neg + DEN_EPS))
            - jnp.log(d2 / (d2 + neg + DEN_EPS)))
    return jnp.sum(loss) * CYCLE_WEIGHT / B


if __name__ == "__main__":
    B, C, H, W = 2, 4, 16, 16
    D = 32                      # embedding dim produced by the synthetic emodel
    F_in = C * H * W            # 1024

    key = jax.random.PRNGKey(0)
    k_xd, k_xdp, k_gsd, k_gspd, k_w, k_b = jax.random.split(key, 6)

    # Activations and encoder weight in bf16 (streamed straight into the MXU);
    # bias stays f32 (used once in the f32 epilogue).
    Xd = jax.random.normal(k_xd, (B, C, H, W), jnp.float32).astype(jnp.bfloat16)
    Xd_prime = jax.random.normal(k_xdp, (B, C, H, W), jnp.float32).astype(jnp.bfloat16)
    gsd = jax.random.normal(k_gsd, (B, C, H, W), jnp.float32).astype(jnp.bfloat16)
    gspd = jax.random.normal(k_gspd, (B, C, H, W), jnp.float32).astype(jnp.bfloat16)

    # Deterministic synthetic emodel parameters (linear F_in -> D).
    # TODO(synk): the real emodel is an arbitrary nn.Module; only a linear
    # projection is fused into the kernel here.
    enc_w = (jax.random.normal(k_w, (F_in, D), jnp.float32) * 0.02).astype(jnp.bfloat16)
    enc_b = jax.random.normal(k_b, (D,), jnp.float32) * 0.01

    # Auto tk: F=1024 fits the VMEM budget -> single-step grid (no K loop).
    loss = cycle_consistency_loss(Xd, Xd_prime, gsd, gspd, enc_w, enc_b)
    loss = jax.block_until_ready(loss)

    ref = jax.block_until_ready(_reference_loss(Xd, Xd_prime, gsd, gspd, enc_w, enc_b))
    assert jnp.isfinite(loss), "non-finite loss"
    assert jnp.allclose(loss, ref, rtol=1e-3, atol=1e-5), (loss, ref)

    print("KERNEL_OK")
</pallas_src>

<mosaic_0001>
module attributes {stable_mosaic.version = 11 : i64} {
  func.func @_cycle_kernel(%arg0: i32, %arg1: memref<8x1024xbf16, #tpu.memory_space<vmem>>, %arg2: memref<1024x32xbf16, #tpu.memory_space<vmem>>, %arg3: memref<1x32xf32, #tpu.memory_space<vmem>>, %arg4: memref<1x1xf32, #tpu.memory_space<vmem>>, %arg5: memref<8x32xf32, #tpu.memory_space<vmem>>) attributes {dimension_semantics = [#tpu.dimension_semantics<arbitrary>], iteration_bounds = array<i64: 1>, scalar_prefetch = 0 : i64, scratch_operands = 1 : i64, tpu.core_type = #tpu.core_type<tc>, window_params = [{transform_indices = @transform_0, window_bounds = array<i64: 8, 1024>}, {transform_indices = @transform_1, window_bounds = array<i64: 1024, 32>}, {pipeline_mode = #tpu.pipeline_mode<synchronous>, transform_indices = @transform_2, window_bounds = array<i64: 1, 32>}, {pipeline_mode = #tpu.pipeline_mode<synchronous>, transform_indices = @transform_3, window_bounds = array<i64: 1, 1>}]} {
    %c0_i32 = arith.constant 0 : i32
    %0 = arith.cmpi eq, %arg0, %c0_i32 : i32
    %1 = arith.extui %0 : i1 to i32
    %c0_i32_0 = arith.constant 0 : i32
    %2 = arith.cmpi ne, %1, %c0_i32_0 : i32
    scf.if %2 {
      %cst_10 = arith.constant 0.000000e+00 : f32
      %12 = vector.broadcast %cst_10 : f32 to vector<8x32xf32>
      %c0_11 = arith.constant 0 : index
      %c0_12 = arith.constant 0 : index
      %13 = vector.load %arg5[%c0_11, %c0_12] : memref<8x32xf32, #tpu.memory_space<vmem>>, vector<8x32xf32>
      tpu.vector_store %arg5[%c0_11, %c0_12], %12 {strides = array<i32>} : memref<8x32xf32, #tpu.memory_space<vmem>>, vector<8x32xf32>,
    } else {
    }
    %c0 = arith.constant 0 : index
    %c0_1 = arith.constant 0 : index
    %3 = vector.load %arg5[%c0, %c0_1] : memref<8x32xf32, #tpu.memory_space<vmem>>, vector<8x32xf32>
    %c0_2 = arith.constant 0 : index
    %c0_3 = arith.constant 0 : index
    %4 = vector.load %arg1[%c0_2, %c0_3] : memref<8x1024xbf16, #tpu.memory_space<vmem>>, vector<8x1024xbf16>
    %c0_4 = arith.constant 0 : index
    %c0_5 = arith.constant 0 : index
    %5 = vector.load %arg2[%c0_4, %c0_5] : memref<1024x32xbf16, #tpu.memory_space<vmem>>, vector<1024x32xbf16>
    %cst = arith.constant dense<0.000000e+00> : vector<8x32xf32>
    %6 = tpu.matmul %4, %5, %cst {dimension_numbers = #tpu.dot_dimension_numbers<[1], [0], [0], [1], [0, 0, 1, 1], [], []>} : vector<8x1024xbf16>, vector<1024x32xbf16>, vector<8x32xf32> -> vector<8x32xf32>
    %7 = arith.addf %3, %6 : vector<8x32xf32>
    %c0_6 = arith.constant 0 : index
    %c0_7 = arith.constant 0 : index
    %8 = vector.load %arg5[%c0_6, %c0_7] : memref<8x32xf32, #tpu.memory_space<vmem>>, vector<8x32xf32>
    tpu.vector_store %arg5[%c0_6, %c0_7], %7 {strides = array<i32>} : memref<8x32xf32, #tpu.memory_space<vmem>>, vector<8x32xf32>,
    %c0_i32_8 = arith.constant 0 : i32
    %9 = arith.cmpi eq, %arg0, %c0_i32_8 : i32
    %10 = arith.extui %9 : i1 to i32
    %c0_i32_9 = arith.constant 0 : i32
    %11 = arith.cmpi ne, %10, %c0_i32_9 : i32
    scf.if %11 {
      %c0_10 = arith.constant 0 : index
      %c0_11 = arith.constant 0 : index
      %12 = vector.load %arg5[%c0_10, %c0_11] : memref<8x32xf32, #tpu.memory_space<vmem>>, vector<8x32xf32>
      %c0_12 = arith.constant 0 : index
      %c0_13 = arith.constant 0 : index
      %13 = vector.load %arg3[%c0_12, %c0_13] : memref<1x32xf32, #tpu.memory_space<vmem>>, vector<1x32xf32>
      %14 = vector.broadcast %13 : vector<1x32xf32> to vector<8x32xf32>
      %15 = arith.addf %12, %14 : vector<8x32xf32>
      %16 = vector.extract_strided_slice %15 {offsets = [0, 0], sizes = [2, 32], strides = [1, 1]} : vector<8x32xf32> to vector<2x32xf32>
      %17 = vector.extract_strided_slice %15 {offsets = [2, 0], sizes = [2, 32], strides = [1, 1]} : vector<8x32xf32> to vector<2x32xf32>
      %18 = vector.extract_strided_slice %15 {offsets = [4, 0], sizes = [2, 32], strides = [1, 1]} : vector<8x32xf32> to vector<2x32xf32>
      %19 = vector.extract_strided_slice %15 {offsets = [6, 0], sizes = [2, 32], strides = [1, 1]} : vector<8x32xf32> to vector<2x32xf32>
      %20 = arith.mulf %18, %17 : vector<2x32xf32>
      %cst_14 = arith.constant dense<0.000000e+00> : vector<2xf32>
      %21 = vector.multi_reduction <add>, %20, %cst_14 [1] : vector<2x32xf32> to vector<2xf32>
      %22 = vector.shape_cast %21 : vector<2xf32> to vector<2x1xf32>
      %23 = arith.mulf %18, %18 : vector<2x32xf32>
      %cst_15 = arith.constant dense<0.000000e+00> : vector<2xf32>
      %24 = vector.multi_reduction <add>, %23, %cst_15 [1] : vector<2x32xf32> to vector<2xf32>
      %25 = vector.shape_cast %24 : vector<2xf32> to vector<2x1xf32>
      %26 = arith.mulf %17, %17 : vector<2x32xf32>
      %cst_16 = arith.constant dense<0.000000e+00> : vector<2xf32>
      %27 = vector.multi_reduction <add>, %26, %cst_16 [1] : vector<2x32xf32> to vector<2xf32>
      %28 = vector.shape_cast %27 : vector<2xf32> to vector<2x1xf32>
      %cst_17 = arith.constant 1.000000e-16 : f32
      %29 = vector.broadcast %cst_17 : f32 to vector<2x1xf32>
      %30 = arith.maximumf %25, %29 : vector<2x1xf32>
      %cst_18 = arith.constant 1.000000e-16 : f32
      %31 = vector.broadcast %cst_18 : f32 to vector<2x1xf32>
      %32 = arith.maximumf %28, %31 : vector<2x1xf32>
      %33 = arith.mulf %30, %32 : vector<2x1xf32>
      %34 = math.rsqrt %33 : vector<2x1xf32>
      %35 = arith.mulf %22, %34 : vector<2x1xf32>
      %cst_19 = arith.constant 2.000000e-01 : f32
      %36 = vector.broadcast %cst_19 : f32 to vector<2x1xf32>
      %37 = arith.subf %35, %36 : vector<2x1xf32>
      %cst_20 = arith.constant 5.000000e+00 : f32
      %38 = vector.broadcast %cst_20 : f32 to vector<2x1xf32>
      %39 = arith.mulf %38, %37 : vector<2x1xf32>
      %40 = math.exp %39 : vector<2x1xf32>
      %41 = math.exp %40 : vector<2x1xf32>
      %42 = vector.shape_cast %41 : vector<2x1xf32> to vector<1x2x1xf32>
      %cst_21 = arith.constant dense<0.000000e+00> : vector<1xf32>
      %43 = vector.multi_reduction <add>, %42, %cst_21 [1, 2] : vector<1x2x1xf32> to vector<1xf32>
      %44 = vector.shape_cast %43 : vector<1xf32> to vector<1x1x1xf32>
      %45 = vector.extract %44[0, 0, 0] : f32 from vector<1x1x1xf32>
      %46 = arith.mulf %19, %17 : vector<2x32xf32>
      %cst_22 = arith.constant dense<0.000000e+00> : vector<2xf32>
      %47 = vector.multi_reduction <add>, %46, %cst_22 [1] : vector<2x32xf32> to vector<2xf32>
      %48 = vector.shape_cast %47 : vector<2xf32> to vector<2x1xf32>
      %49 = arith.mulf %19, %19 : vector<2x32xf32>
      %cst_23 = arith.constant dense<0.000000e+00> : vector<2xf32>
      %50 = vector.multi_reduction <add>, %49, %cst_23 [1] : vector<2x32xf32> to vector<2xf32>
      %51 = vector.shape_cast %50 : vector<2xf32> to vector<2x1xf32>
      %52 = arith.mulf %17, %17 : vector<2x32xf32>
      %cst_24 = arith.constant dense<0.000000e+00> : vector<2xf32>
      %53 = vector.multi_reduction <add>, %52, %cst_24 [1] : vector<2x32xf32> to vector<2xf32>
      %54 = vector.shape_cast %53 : vector<2xf32> to vector<2x1xf32>
      %cst_25 = arith.constant 1.000000e-16 : f32
      %55 = vector.broadcast %cst_25 : f32 to vector<2x1xf32>
      %56 = arith.maximumf %51, %55 : vector<2x1xf32>
      %cst_26 = arith.constant 1.000000e-16 : f32
      %57 = vector.broadcast %cst_26 : f32 to vector<2x1xf32>
      %58 = arith.maximumf %54, %57 : vector<2x1xf32>
      %59 = arith.mulf %56, %58 : vector<2x1xf32>
      %60 = math.rsqrt %59 : vector<2x1xf32>
      %61 = arith.mulf %48, %60 : vector<2x1xf32>
      %cst_27 = arith.constant 2.000000e-01 : f32
      %62 = vector.broadcast %cst_27 : f32 to vector<2x1xf32>
      %63 = arith.subf %61, %62 : vector<2x1xf32>
      %cst_28 = arith.constant 5.000000e+00 : f32
      %64 = vector.broadcast %cst_28 : f32 to vector<2x1xf32>
      %65 = arith.mulf %64, %63 : vector<2x1xf32>
      %66 = math.exp %65 : vector<2x1xf32>
      %67 = math.exp %66 : vector<2x1xf32>
      %68 = vector.shape_cast %67 : vector<2x1xf32> to vector<1x2x1xf32>
      %cst_29 = arith.constant dense<0.000000e+00> : vector<1xf32>
      %69 = vector.multi_reduction <add>, %68, %cst_29 [1, 2] : vector<1x2x1xf32> to vector<1xf32>
      %70 = vector.shape_cast %69 : vector<1xf32> to vector<1x1x1xf32>
      %71 = vector.extract %70[0, 0, 0] : f32 from vector<1x1x1xf32>
      %72 = arith.addf %45, %71 : f32
      %73 = arith.mulf %18, %16 : vector<2x32xf32>
      %cst_30 = arith.constant dense<0.000000e+00> : vector<2xf32>
      %74 = vector.multi_reduction <add>, %73, %cst_30 [1] : vector<2x32xf32> to vector<2xf32>
      %75 = vector.shape_cast %74 : vector<2xf32> to vector<2x1xf32>
      %76 = arith.mulf %18, %18 : vector<2x32xf32>
      %cst_31 = arith.constant dense<0.000000e+00> : vector<2xf32>
      %77 = vector.multi_reduction <add>, %76, %cst_31 [1] : vector<2x32xf32> to vector<2xf32>
      %78 = vector.shape_cast %77 : vector<2xf32> to vector<2x1xf32>
      %79 = arith.mulf %16, %16 : vector<2x32xf32>
      %cst_32 = arith.constant dense<0.000000e+00> : vector<2xf32>
      %80 = vector.multi_reduction <add>, %79, %cst_32 [1] : vector<2x32xf32> to vector<2xf32>
      %81 = vector.shape_cast %80 : vector<2xf32> to vector<2x1xf32>
      %cst_33 = arith.constant 1.000000e-16 : f32
      %82 = vector.broadcast %cst_33 : f32 to vector<2x1xf32>
      %83 = arith.maximumf %78, %82 : vector<2x1xf32>
      %cst_34 = arith.constant 1.000000e-16 : f32
      %84 = vector.broadcast %cst_34 : f32 to vector<2x1xf32>
      %85 = arith.maximumf %81, %84 : vector<2x1xf32>
      %86 = arith.mulf %83, %85 : vector<2x1xf32>
      %87 = math.rsqrt %86 : vector<2x1xf32>
      %88 = arith.mulf %75, %87 : vector<2x1xf32>
      %cst_35 = arith.constant 2.000000e-01 : f32
      %89 = vector.broadcast %cst_35 : f32 to vector<2x1xf32>
      %90 = arith.subf %88, %89 : vector<2x1xf32>
      %cst_36 = arith.constant 5.000000e+00 : f32
      %91 = vector.broadcast %cst_36 : f32 to vector<2x1xf32>
      %92 = arith.mulf %91, %90 : vector<2x1xf32>
      %93 = math.exp %92 : vector<2x1xf32>
      %94 = arith.mulf %19, %16 : vector<2x32xf32>
      %cst_37 = arith.constant dense<0.000000e+00> : vector<2xf32>
      %95 = vector.multi_reduction <add>, %94, %cst_37 [1] : vector<2x32xf32> to vector<2xf32>
      %96 = vector.shape_cast %95 : vector<2xf32> to vector<2x1xf32>
      %97 = arith.mulf %19, %19 : vector<2x32xf32>
      %cst_38 = arith.constant dense<0.000000e+00> : vector<2xf32>
      %98 = vector.multi_reduction <add>, %97, %cst_38 [1] : vector<2x32xf32> to vector<2xf32>
      %99 = vector.shape_cast %98 : vector<2xf32> to vector<2x1xf32>
      %100 = arith.mulf %16, %16 : vector<2x32xf32>
      %cst_39 = arith.constant dense<0.000000e+00> : vector<2xf32>
      %101 = vector.multi_reduction <add>, %100, %cst_39 [1] : vector<2x32xf32> to vector<2xf32>
      %102 = vector.shape_cast %101 : vector<2xf32> to vector<2x1xf32>
      %cst_40 = arith.constant 1.000000e-16 : f32
      %103 = vector.broadcast %cst_40 : f32 to vector<2x1xf32>
      %104 = arith.maximumf %99, %103 : vector<2x1xf32>
      %cst_41 = arith.constant 1.000000e-16 : f32
      %105 = vector.broadcast %cst_41 : f32 to vector<2x1xf32>
      %106 = arith.maximumf %102, %105 : vector<2x1xf32>
      %107 = arith.mulf %104, %106 : vector<2x1xf32>
      %108 = math.rsqrt %107 : vector<2x1xf32>
      %109 = arith.mulf %96, %108 : vector<2x1xf32>
      %cst_42 = arith.constant 2.000000e-01 : f32
      %110 = vector.broadcast %cst_42 : f32 to vector<2x1xf32>
      %111 = arith.subf %109, %110 : vector<2x1xf32>
      %cst_43 = arith.constant 5.000000e+00 : f32
      %112 = vector.broadcast %cst_43 : f32 to vector<2x1xf32>
      %113 = arith.mulf %112, %111 : vector<2x1xf32>
      %114 = math.exp %113 : vector<2x1xf32>
      %115 = vector.broadcast %72 : f32 to vector<2x1xf32>
      %116 = arith.addf %93, %115 : vector<2x1xf32>
      %cst_44 = arith.constant 9.99999997E-7 : f32
      %117 = vector.broadcast %cst_44 : f32 to vector<2x1xf32>
      %118 = arith.addf %116, %117 : vector<2x1xf32>
      %119 = arith.divf %93, %118 : vector<2x1xf32>
      %120 = math.log %119 : vector<2x1xf32>
      %cst_45 = arith.constant 0.000000e+00 : f32
      %121 = vector.broadcast %cst_45 : f32 to vector<2x1xf32>
      %122 = arith.subf %121, %120 : vector<2x1xf32>
      %123 = vector.broadcast %72 : f32 to vector<2x1xf32>
      %124 = arith.addf %114, %123 : vector<2x1xf32>
      %cst_46 = arith.constant 9.99999997E-7 : f32
      %125 = vector.broadcast %cst_46 : f32 to vector<2x1xf32>
      %126 = arith.addf %124, %125 : vector<2x1xf32>
      %127 = arith.divf %114, %126 : vector<2x1xf32>
      %128 = math.log %127 : vector<2x1xf32>
      %129 = arith.subf %122, %128 : vector<2x1xf32>
      %130 = vector.shape_cast %129 : vector<2x1xf32> to vector<1x2x1xf32>
      %cst_47 = arith.constant dense<0.000000e+00> : vector<1xf32>
      %131 = vector.multi_reduction <add>, %130, %cst_47 [1, 2] : vector<1x2x1xf32> to vector<1xf32>
      %132 = vector.shape_cast %131 : vector<1xf32> to vector<1x1x1xf32>
      %133 = vector.extract %132[0, 0, 0] : f32 from vector<1x1x1xf32>
      %134 = vector.broadcast %133 : f32 to vector<1x1xf32>
      %cst_48 = arith.constant 2.500000e-01 : f32
      %135 = vector.broadcast %cst_48 : f32 to vector<1x1xf32>
      %136 = arith.mulf %134, %135 : vector<1x1xf32>
      %c0_49 = arith.constant 0 : index
      %c0_50 = arith.constant 0 : index
      %137 = vector.load %arg4[%c0_49, %c0_50] : memref<1x1xf32, #tpu.memory_space<vmem>>, vector<1x1xf32>
      tpu.vector_store %arg4[%c0_49, %c0_50], %136 {strides = array<i32>} : memref<1x1xf32, #tpu.memory_space<vmem>>, vector<1x1xf32>,
    } else {
    }
    return
  }
  func.func @transform_0(%arg0: i32) -> (i32, i32) {
    %c0_i32 = arith.constant 0 : i32
    %c0_i32_0 = arith.constant 0 : i32
    return %c0_i32, %arg0 : i32, i32
  }
  func.func @transform_1(%arg0: i32) -> (i32, i32) {
    %c0_i32 = arith.constant 0 : i32
    %c0_i32_0 = arith.constant 0 : i32
    return %arg0, %c0_i32 : i32, i32
  }
  func.func @transform_2(%arg0: i32) -> (i32, i32) {
    %c0_i32 = arith.constant 0 : i32
    %c0_i32_0 = arith.constant 0 : i32
    %c0_i32_1 = arith.constant 0 : i32
    return %c0_i32, %c0_i32_0 : i32, i32
  }
  func.func @transform_3(%arg0: i32) -> (i32, i32) {
    %c0_i32 = arith.constant 0 : i32
    %c0_i32_0 = arith.constant 0 : i32
    %c0_i32_1 = arith.constant 0 : i32
    return %c0_i32, %c0_i32_0 : i32, i32
  }
}

</mosaic_0001>

<bundles_post_ra>
// kernel: tpu_custom_call.1
= control target key start
LH: loop header
LB: loop body
LE: loop exit
PB: predicated region body
PF: predicated region fallthrough
CT: control target
= control target key end

     0   :  { %s1555_s0 = inlined_call_operand.vmem [shape: bf16[8,1024], index: 0, kind: input, shape index: {}]   ;;  %s1556_s1 = inlined_call_operand.vmem [shape: bf16[1024,32], index: 1, kind: input, shape index: {}]   ;;  %s1557_s2 = inlined_call_operand.vmem [shape: f32[1,32], index: 2, kind: input, shape index: {}]   ;;  %s1558_s3 = inlined_call_operand.hbm [shape: f32[1,1], index: 3, kind: output, shape index: {}]  }
   0x1   :  { %v1175_v0 = vld [vmem:[%s1556_s1 + $0x38] sm:$0xff]  ;;  %v1174_v4 = vld [vmem:[%s1556_s1 + $0x30] sm:$0xff]  ;;  %v1173_v8 = vld [vmem:[%s1556_s1 + $0x28] sm:$0xff] }
   0x2   :  { %v1183_v1 = vld [vmem:[%s1556_s1 + $0x78] sm:$0xff]  ;;  %566 = vmatpush.bf16.msra.mxu0 %v1175_v0  ;;  %v1182_v5 = vld [vmem:[%s1556_s1 + $0x70] sm:$0xff]  ;;  %v1181_v9 = vld [vmem:[%s1556_s1 + $0x68] sm:$0xff] }
   0x3   :  { %v1191_v2 = vld [vmem:[%s1556_s1 + $0xb8] sm:$0xff]  ;;  %579 = vmatpush.bf16.msra.mxu1 %v1183_v1  ;;  %v1190_v6 = vld [vmem:[%s1556_s1 + $0xb0] sm:$0xff]  ;;  %v1189_v10 = vld [vmem:[%s1556_s1 + $0xa8] sm:$0xff] }
   0x4   :  { %v1199_v3 = vld [vmem:[%s1556_s1 + $0xf8] sm:$0xff]  ;;  %592 = vmatpush.bf16.msra.mxu2 %v1191_v2  ;;  %v1198_v7 = vld [vmem:[%s1556_s1 + $0xf0] sm:$0xff]  ;;  %v1197_v11 = vld [vmem:[%s1556_s1 + $0xe8] sm:$0xff] }
   0x5   :  { %605 = vmatpush.bf16.msra.mxu3 %v1199_v3  ;;  %v1172_v12 = vld [vmem:[%s1556_s1 + $0x20] sm:$0xff]  ;;  %v1171_v16 = vld [vmem:[%s1556_s1 + $0x18] sm:$0xff]  ;;  %v1170_v20 = vld [vmem:[%s1556_s1 + $0x10] sm:$0xff] }
   0x6   :  { %567 = vmatpush.bf16.msra.mxu0 %v1174_v4  ;;  %v1180_v13 = vld [vmem:[%s1556_s1 + $0x60] sm:$0xff]  ;;  %v1179_v17 = vld [vmem:[%s1556_s1 + $0x58] sm:$0xff]  ;;  %v1178_v21 = vld [vmem:[%s1556_s1 + $0x50] sm:$0xff] }
   0x7   :  { %580 = vmatpush.bf16.msra.mxu1 %v1182_v5  ;;  %v1188_v14 = vld [vmem:[%s1556_s1 + $0xa0] sm:$0xff]  ;;  %v1187_v18 = vld [vmem:[%s1556_s1 + $0x98] sm:$0xff] }
   0x8   :  { %593 = vmatpush.bf16.msra.mxu2 %v1190_v6  ;;  %v1196_v15 = vld [vmem:[%s1556_s1 + $0xe0] sm:$0xff]  ;;  %v1195_v19 = vld [vmem:[%s1556_s1 + $0xd8] sm:$0xff] }
   0x9   :  { %606 = vmatpush.bf16.msra.mxu3 %v1198_v7 }
   0xa   :  { %568 = vmatpush.bf16.msra.mxu0 %v1173_v8 }
   0xb   :  { %581 = vmatpush.bf16.msra.mxu1 %v1181_v9 }
   0xc   :  { %594 = vmatpush.bf16.msra.mxu2 %v1189_v10 }
   0xd   :  { %607 = vmatpush.bf16.msra.mxu3 %v1197_v11 }
   0xe   :  { %569 = vmatpush.bf16.msra.mxu0 %v1172_v12 }
   0xf   :  { %582 = vmatpush.bf16.msra.mxu1 %v1180_v13 }
  0x10   :  { %595 = vmatpush.bf16.msra.mxu2 %v1188_v14 }
  0x11   :  { %608 = vmatpush.bf16.msra.mxu3 %v1196_v15 }
  0x12   :  { %570 = vmatpush.bf16.msra.mxu0 %v1171_v16 }
  0x13   :  { %583 = vmatpush.bf16.msra.mxu1 %v1179_v17 }
  0x14   :  { %8 = vsyncpa [#allocation4], 0  ;;  %596 = vmatpush.bf16.msra.mxu2 %v1187_v18  ;;  %v1186_v22 = vld [vmem:[%s1556_s1 + $0x90] sm:$0xff]  ;;  %v1169_v24 = vld [vmem:[%s1556_s1 + $0x8] sm:$0xff]  ;;  %vm19_vm0 = vcmask 261120   ;;  %vm738_vm1 = vcmask 261126  }
  0x15   :  { %609 = vmatpush.bf16.msra.mxu3 %v1195_v19  ;;  %v1194_v23 = vld [vmem:[%s1556_s1 + $0xd0] sm:$0xff]  ;;  %v1177_v25 = vld [vmem:[%s1556_s1 + $0x48] sm:$0xff]  ;;  %v22_v29 = vld [vmem:[%s1555_s0] sm:$0xff]  ;;  %vm694_vm2 = vcmask 257026   ;;  %vm686_vm3 = vcmask 259076   ;;  %vm783_vm4 = vcmask 254976  }
  0x16   :  { %571 = vmatpush.bf16.msra.mxu0 %v1170_v20  ;;  %v1185_v26 = vld [vmem:[%s1556_s1 + $0x88] sm:$0xff]  ;;  %v1168_v30 = vld [vmem:[%s1556_s1] sm:$0xff]  ;;  %v158_v33 = vunpack.c.l.b16 %v22_v29  ;;  %v159_v37 = vunpack.c.h.b16 %v22_v29  ;;  %v1207_v38 = vld [vmem:[%s1556_s1 + $0x138] sm:$0xff]  ;;  %vm724_vm11 = vcmask 1024   ;;  %s1296_s15 = smov [#allocation3]   ;;  %s899_s19 = sshll.u32 %s1558_s3, 4  ;;  %s900_s19 = int_to_ptr.hbm [resolvable:$true] %s899_s19 }
  0x17   :  { %584 = vmatpush.bf16.msra.mxu1 %v1178_v21  ;;  %v1193_v27 = vld [vmem:[%s1556_s1 + $0xc8] sm:$0xff]  ;;  %v1176_v31 = vld [vmem:[%s1556_s1 + $0x40] sm:$0xff]  ;;  %v1215_v39 = vld [vmem:[%s1556_s1 + $0x178] sm:$0xff]  ;;  %s897_s16 = sshll.u32 %s1296_s15, 4  ;;  %s898_s16 = int_to_ptr.vmem [resolvable:$true] %s897_s16 }
  0x18   :  { %597 = vmatpush.bf16.msra.mxu2 %v1186_v22  ;;  %v23_v28 = vld [vmem:[%s1555_s0 + $0x8] sm:$0xff]  ;;  %v1184_v34 = vld [vmem:[%s1556_s1 + $0x80] sm:$0xff]  ;;  %v1223_v40 = vld [vmem:[%s1556_s1 + $0x1b8] sm:$0xff]  ;;  %v166_v43 = vpack.c.b16 %v158_v33, %v158_v33  ;;  %v167_v45 = vpack.c.b16 %v159_v37, %v159_v37  ;;  %v1295_v22 = vmov 0.0  }
  0x19   :  { %610 = vmatpush.bf16.msra.mxu3 %v1194_v23  ;;  %v160_v32 = vunpack.c.l.b16 %v23_v28  ;;  %v1192_v35 = vld [vmem:[%s1556_s1 + $0xc0] sm:$0xff]  ;;  %v161_v36 = vunpack.c.h.b16 %v23_v28  ;;  %v1231_v41 = vld [vmem:[%s1556_s1 + $0x1f8] sm:$0xff]  ;;  %v1206_v46 = vld [vmem:[%s1556_s1 + $0x130] sm:$0xff]  ;;  %20 = vst.msk [vmem:[#allocation2] sm:$0xff] %vm19_vm0, %v1295_v22 }
  0x1a   :  { %572 = vmatpush.bf16.msra.mxu0 %v1169_v24  ;;  %v1214_v47 = vld [vmem:[%s1556_s1 + $0x170] sm:$0xff]  ;;  %v1205_v50 = vld [vmem:[%s1556_s1 + $0x128] sm:$0xff]  ;;  %v1204_v54 = vld [vmem:[%s1556_s1 + $0x120] sm:$0xff] }
  0x1b   :  { %585 = vmatpush.bf16.msra.mxu1 %v1177_v25  ;;  %v168_v42 = vpack.c.b16 %v160_v32, %v160_v32  ;;  %v169_v44 = vpack.c.b16 %v161_v36, %v161_v36  ;;  %v1222_v48 = vld [vmem:[%s1556_s1 + $0x1b0] sm:$0xff]  ;;  %v1213_v51 = vld [vmem:[%s1556_s1 + $0x168] sm:$0xff]  ;;  %v1212_v55 = vld [vmem:[%s1556_s1 + $0x160] sm:$0xff] }
  0x1c   :  { %598 = vmatpush.bf16.msra.mxu2 %v1185_v26  ;;  %v1230_v49 = vld [vmem:[%s1556_s1 + $0x1f0] sm:$0xff]  ;;  %v1221_v52 = vld [vmem:[%s1556_s1 + $0x1a8] sm:$0xff]  ;;  %v1220_v56 = vld [vmem:[%s1556_s1 + $0x1a0] sm:$0xff] }
  0x1d   :  { %611 = vmatpush.bf16.msra.mxu3 %v1193_v27  ;;  %v1229_v53 = vld [vmem:[%s1556_s1 + $0x1e8] sm:$0xff]  ;;  %v1228_v57 = vld [vmem:[%s1556_s1 + $0x1e0] sm:$0xff]  ;;  %v1203_v58 = vld [vmem:[%s1556_s1 + $0x118] sm:$0xff] }
  0x1e   :  { %573 = vmatpush.bf16.msra.mxu0 %v1168_v30  ;;  %v1211_v59 = vld [vmem:[%s1556_s1 + $0x158] sm:$0xff]  ;;  %v1202_v62 = vld [vmem:[%s1556_s1 + $0x110] sm:$0xff]  ;;  %v1201_v2 = vld [vmem:[%s1556_s1 + $0x108] sm:$0xff] }
  0x1f   :  { %586 = vmatpush.bf16.msra.mxu1 %v1176_v31  ;;  %v1219_v60 = vld [vmem:[%s1556_s1 + $0x198] sm:$0xff]  ;;  %v1210_v63 = vld [vmem:[%s1556_s1 + $0x150] sm:$0xff]  ;;  %v1209_v3 = vld [vmem:[%s1556_s1 + $0x148] sm:$0xff] }
  0x20   :  { %599 = vmatpush.bf16.msra.mxu2 %v1184_v34  ;;  %v1227_v61 = vld [vmem:[%s1556_s1 + $0x1d8] sm:$0xff]  ;;  %v1218_v0 = vld [vmem:[%s1556_s1 + $0x190] sm:$0xff]  ;;  %v1217_v5 = vld [vmem:[%s1556_s1 + $0x188] sm:$0xff] }
  0x21   :  { %612 = vmatpush.bf16.msra.mxu3 %v1192_v35  ;;  %574 = vmatmul.bf16.vlgmr.msra.gmra.mxu0 %v166_v43  ;;  %v1226_v1 = vld [vmem:[%s1556_s1 + $0x1d0] sm:$0xff]  ;;  %v1225_v6 = vld [vmem:[%s1556_s1 + $0x1c8] sm:$0xff]  ;;  %v25_v7 = vld [vmem:[%s1555_s0 + $0x18] sm:$0xff] }
  0x22   :  { %618 = vmatpush.bf16.msrb.mxu0 %v1207_v38  ;;  %587 = vmatmul.bf16.vlgmr.msra.gmra.mxu1 %v167_v45  ;;  %v24_v4 = vld [vmem:[%s1555_s0 + $0x10] sm:$0xff]  ;;  %v1200_v10 = vld [vmem:[%s1556_s1 + $0x100] sm:$0xff]  ;;  %v164_v12 = vunpack.c.l.b16 %v25_v7  ;;  %v165_v13 = vunpack.c.h.b16 %v25_v7 }
  0x23   :  { %631 = vmatpush.bf16.msrb.mxu1 %v1215_v39  ;;  %600 = vmatmul.bf16.vlgmr.msra.gmra.mxu2 %v168_v42  ;;  %v162_v8 = vunpack.c.l.b16 %v24_v4  ;;  %v163_v9 = vunpack.c.h.b16 %v24_v4  ;;  %v1208_v11 = vld [vmem:[%s1556_s1 + $0x140] sm:$0xff] }
  0x24   :  { %644 = vmatpush.bf16.msrb.mxu2 %v1223_v40  ;;  %613 = vmatmul.bf16.vlgmr.msra.gmra.mxu3 %v169_v44  ;;  %v1216_v14 = vld [vmem:[%s1556_s1 + $0x180] sm:$0xff]  ;;  %v172_v18 = vpack.c.b16 %v164_v12, %v164_v12  ;;  %v173_v19 = vpack.c.b16 %v165_v13, %v165_v13 }
  0x25   :  { %657 = vmatpush.bf16.msrb.mxu3 %v1231_v41  ;;  %v1224_v15 = vld [vmem:[%s1556_s1 + $0x1c0] sm:$0xff]  ;;  %v170_v16 = vpack.c.b16 %v162_v8, %v162_v8  ;;  %v171_v17 = vpack.c.b16 %v163_v9, %v163_v9 }
  0x26   :  { %619 = vmatpush.bf16.msrb.mxu0 %v1206_v46  ;;  %v21_v41 = vld [vmem:[#allocation2] sm:$0xff] }
  0x27   :  { %632 = vmatpush.bf16.msrb.mxu1 %v1214_v47  ;;  %v1240_v46 = vld [vmem:[%s1557_s2] ss:$0 sm:$0xff] }
  0x28   :  { %645 = vmatpush.bf16.msrb.mxu2 %v1222_v48 }
  0x29   :  { %658 = vmatpush.bf16.msrb.mxu3 %v1230_v49 }
  0x2a   :  { %620 = vmatpush.bf16.msrb.mxu0 %v1205_v50 }
  0x2b   :  { %633 = vmatpush.bf16.msrb.mxu1 %v1213_v51 }
  0x2c   :  { %646 = vmatpush.bf16.msrb.mxu2 %v1221_v52 }
  0x2d   :  { %659 = vmatpush.bf16.msrb.mxu3 %v1229_v53 }
  0x2e   :  { %621 = vmatpush.bf16.msrb.mxu0 %v1204_v54 }
  0x2f   :  { %634 = vmatpush.bf16.msrb.mxu1 %v1212_v55 }
  0x30   :  { %647 = vmatpush.bf16.msrb.mxu2 %v1220_v56 }
  0x31   :  { %660 = vmatpush.bf16.msrb.mxu3 %v1228_v57 }
  0x32   :  { %622 = vmatpush.bf16.msrb.mxu0 %v1203_v58 }
  0x33   :  { %635 = vmatpush.bf16.msrb.mxu1 %v1211_v59 }
  0x34   :  { %648 = vmatpush.bf16.msrb.mxu2 %v1219_v60 }
  0x35   :  { %661 = vmatpush.bf16.msrb.mxu3 %v1227_v61 }
  0x36   :  { %623 = vmatpush.bf16.msrb.mxu0 %v1202_v62 }
  0x37   :  { %636 = vmatpush.bf16.msrb.mxu1 %v1210_v63 }
  0x38   :  { %649 = vmatpush.bf16.msrb.mxu2 %v1218_v0 }
  0x39   :  { %662 = vmatpush.bf16.msrb.mxu3 %v1226_v1 }
  0x3a   :  { %624 = vmatpush.bf16.msrb.mxu0 %v1201_v2 }
  0x3b   :  { %637 = vmatpush.bf16.msrb.mxu1 %v1209_v3 }
  0x3c   :  { %650 = vmatpush.bf16.msrb.mxu2 %v1217_v5 }
  0x3d   :  { %663 = vmatpush.bf16.msrb.mxu3 %v1225_v6 }
  0x3e   :  { %625 = vmatpush.bf16.msrb.mxu0 %v1200_v10 }
  0x3f   :  { %638 = vmatpush.bf16.msrb.mxu1 %v1208_v11 }
  0x40   :  { %651 = vmatpush.bf16.msrb.mxu2 %v1216_v14 }
  0x41   :  { %664 = vmatpush.bf16.msrb.mxu3 %v1224_v15  ;;  %626 = vmatmul.bf16.vlgmr.msrb.gmra.mxu0 %v170_v16 }
  0x42   :  { %639 = vmatmul.bf16.vlgmr.msrb.gmra.mxu1 %v171_v17 }
  0x43   :  { %652 = vmatmul.bf16.vlgmr.msrb.gmra.mxu2 %v172_v18 }
  0x44   :  { %665 = vmatmul.bf16.vlgmr.msrb.gmra.mxu3 %v173_v19 }
  0x9e   :  { %v575_v20 = vpop.f32.mrf.mxu0 }
  0x9f   :  { %v588_v21 = vpop.f32.mrf.mxu1 }
  0xa0   :  { %v589_v29 = vadd.f32 %v588_v21, %v575_v20 }
  0xa6   :  { %v601_v23 = vpop.f32.mrf.mxu2  ;;  %v577_v25 = vpop.f32.mrf.mxu0 }
  0xa7   :  { %v614_v24 = vpop.f32.mrf.mxu3  ;;  %v590_v26 = vpop.f32.mrf.mxu1  ;;  %v602_v30 = vadd.f32 %v601_v23, %v589_v29 }
  0xa9   :  { %v615_v31 = vadd.f32 %v614_v24, %v602_v30 }
  0xae   :  { %v603_v27 = vpop.f32.mrf.mxu2 }
  0xaf   :  { %v616_v28 = vpop.f32.mrf.mxu3 }
  0xbe   :  { %v627_v32 = vpop.f32.mrf.mxu0 }
  0xbf   :  { %v640_v33 = vpop.f32.mrf.mxu1  ;;  %v628_v34 = vadd.f32 %v627_v32, %v615_v31 }
  0xc1   :  { %v641_v35 = vadd.f32 %v640_v33, %v628_v34 }
  0xc6   :  { %v653_v36 = vpop.f32.mrf.mxu2  ;;  %v629_v39 = vpop.f32.mrf.mxu0 }
  0xc7   :  { %v666_v37 = vpop.f32.mrf.mxu3  ;;  %v654_v38 = vadd.f32 %v653_v36, %v641_v35  ;;  %v642_v40 = vpop.f32.mrf.mxu1 }
  0xc9   :  { %v667_v42 = vadd.f32 %v666_v37, %v654_v38 }
  0xcb   :  { %v670_v43 = vadd.f32 %v667_v42, %v21_v41 }
  0xcd   :  { %672 = vst.msk [vmem:[#allocation2] sm:$0xff] %vm19_vm0, %v670_v43 }
  0xce   :  { %v655_v44 = vpop.f32.mrf.mxu2 }
  0xcf   :  { %v668_v45 = vpop.f32.mrf.mxu3 }
  0xd4   :  { %v676_v47 = vld [vmem:[#allocation2] sm:$0xff] }
  0xd5   :  { %v681_v48 = vadd.f32 %v1240_v46, %v676_v47 }
  0xd7   :  { %v690_v49 = vmul.f32 %v681_v48, %v681_v48  ;;  %v735_v50 = vrot.slane %v681_v48, 4  ;;  %v807_v51 = vrot.slane %v681_v48, 2  ;;  %v683_v55 = vrot.slane %v681_v48, 6 }
  0xd9   :  { %v742_v52 = vsel %vm738_vm1, %v690_v49, 0.0  ;;  %v695_v53 = vsel %vm694_vm2, %v690_v49, 0.0  ;;  %v737_v54 = vmul.f32 %v735_v50, %v681_v48  ;;  %v809_v56 = vmul.f32 %v807_v51, %v681_v48 }
  0xda   :  { %743 = vadd.xlane.f32.xlu1 %v742_v52  ;;  %696 = vadd.xlane.f32.xlu0 %v695_v53  ;;  %v685_v60 = vmul.f32 %v683_v55, %v681_v48  ;;  %v691_v61 = vsel %vm686_vm3, %v690_v49, 0.0  ;;  %v784_v63 = vsel %vm783_vm4, %v690_v49, 0.0 }
  0xdb   :  { %v739_v57 = vsel %vm738_vm1, %v737_v54, 0.0  ;;  %v1528_v58 = vsel %vm686_vm3, %v737_v54, 0.0  ;;  %v1531_v59 = vsel %vm738_vm1, %v809_v56, 0.0 }
  0xdc   :  { %740 = vadd.xlane.f32.xlu2 %v739_v57  ;;  %v687_v62 = vsel %vm686_vm3, %v685_v60, 0.0 }
  0xe2   :  { %692 = vadd.xlane.f32.xlu0 %v691_v61  ;;  %688 = vadd.xlane.f32.xlu1 %v687_v62 }
  0xea   :  { %785 = vadd.xlane.f32.xlu1 %v784_v63 }
 0x14d   :  { %v1533_v0 = vpop.xlane.xlu1 %743  ;;  %v697_v1 = vpop.xlane.xlu0 %696 }
 0x14e   :  { %v699_v2 = vmax.f32 %v697_v1, 1e-16  ;;  %v745_v3 = vmax.f32 %v1533_v0, 1e-16 }
 0x14f   :  { %v741_v19 = vpop.xlane.xlu2 %740 }
 0x150   :  { %v746_v4 = vrot.slane %v699_v2, 4  ;;  %v701_v7 = vrot.slane %v699_v2, 6 }
 0x152   :  { %v748_v5 = vmul.f32 %v746_v4, %v745_v3 }
 0x154   :  { %1241 = vrsqrt.f32 %v748_v5  ;;  %vm755_vm6 = vweird.f32 %v748_v5 }
 0x155   :  { %v1538_v6 = vpop.xlane.xlu0 %692  ;;  %v689_v28 = vpop.xlane.xlu1 %688 }
 0x156   :  { %v698_v8 = vmax.f32 %v1538_v6, 1e-16 }
 0x158   :  { %v703_v9 = vmul.f32 %v701_v7, %v698_v8 }
 0x15a   :  { %v1242_v10 = vpop.eup %1241  ;;  %1243 = vrsqrt.f32 %v703_v9  ;;  %vm710_vm9 = vweird.f32 %v703_v9 }
 0x15b   :  { %v750_v11 = vmul.f32 %v1242_v10, %v748_v5  ;;  %vm756_vm5 = vweird.f32 %v1242_v10 }
 0x15c   :  { %vm757_vm7 = vmor %vm755_vm6, %vm756_vm5 }
 0x15d   :  { %v751_v12 = vmul.f32 %v1242_v10, %v750_v11  ;;  %v786_v47 = vpop.xlane.xlu1 %785 }
 0x15e   :  { %v787_v50 = vmax.f32 %v786_v47, 1e-16 }
 0x15f   :  { %v752_v13 = vmul.f32 0.5, %v751_v12 }
 0x160   :  { %v1244_v14 = vpop.eup %1243  ;;  %v813_v54 = vrot.slane %v787_v50, 2  ;;  %v789_v56 = vrot.slane %v787_v50, 4 }
 0x161   :  { %v753_v15 = vsub.f32 1.5, %v752_v13  ;;  %v705_v16 = vmul.f32 %v1244_v14, %v703_v9  ;;  %vm711_vm8 = vweird.f32 %v1244_v14 }
 0x162   :  { %vm712_vm10 = vmor %vm710_vm9, %vm711_vm8 }
 0x163   :  { %v754_v17 = vmul.f32 %v1242_v10, %v753_v15  ;;  %v706_v18 = vmul.f32 %v1244_v14, %v705_v16 }
 0x165   :  { %v758_v20 = vsel %vm757_vm7, %v1242_v10, %v754_v17  ;;  %v707_v21 = vmul.f32 0.5, %v706_v18 }
 0x166   :  { %v759_v22 = vmul.f32 %v758_v20, %v741_v19 }
 0x167   :  { %v708_v23 = vsub.f32 1.5, %v707_v21 }
 0x168   :  { %v1165_v24 = vadd.f32 -0.2, %v759_v22 }
 0x169   :  { %v709_v25 = vmul.f32 %v1244_v14, %v708_v23 }
 0x16a   :  { %v761_v26 = vmul.f32 5.0, %v1165_v24 }
 0x16b   :  { %v713_v27 = vsel %vm712_vm10, %v1244_v14, %v709_v25  ;;  %vm890_vm10 = vcmask 0  }
 0x16c   :  { %v762_v29 = vmul.f32 1.442695, %v761_v26  ;;  %v714_v30 = vmul.f32 %v713_v27, %v689_v28 }
 0x16e   :  { %1245 = vpow2.f32 %v762_v29  ;;  %v1164_v31 = vadd.f32 -0.2, %v714_v30 }
 0x170   :  { %v716_v32 = vmul.f32 5.0, %v1164_v31 }
 0x172   :  { %v717_v33 = vmul.f32 1.442695, %v716_v32 }
 0x174   :  { %v1246_v34 = vpop.eup %1245  ;;  %1247 = vpow2.f32 %v717_v33 }
 0x175   :  { %v764_v35 = vmul.f32 1.442695, %v1246_v34 }
 0x177   :  { %1249 = vpow2.f32 %v764_v35 }
 0x17a   :  { %v1248_v36 = vpop.eup %1247 }
 0x17b   :  { %v719_v37 = vmul.f32 1.442695, %v1248_v36 }
 0x17d   :  { %v1250_v38 = vpop.eup %1249  ;;  %1251 = vpow2.f32 %v719_v37 }
 0x17e   :  { %v767_v39 = vrot.slane %v1250_v38, 6 }
 0x180   :  { %v769_v40 = vsel %vm724_vm11, %v767_v39, 0.0 }
 0x181   :  { %770 = vadd.xlane.f32.xlu0 %v769_v40 }
 0x183   :  { %v1252_v41 = vpop.eup %1251 }
 0x184   :  { %v722_v42 = vrot.slane %v1252_v41, 4 }
 0x186   :  { %v725_v43 = vsel %vm724_vm11, %v722_v42, 0.0 }
 0x187   :  { %726 = vadd.xlane.f32.xlu2 %v725_v43 }
 0x189   :  { %811 = vadd.xlane.f32.xlu0 %v1531_v59  ;;  %v815_v59 = vmul.f32 %v813_v54, %v745_v3 }
 0x18b   :  { %1253 = vrsqrt.f32 %v815_v59  ;;  %vm822_vm14 = vweird.f32 %v815_v59 }
 0x18f   :  { %781 = vadd.xlane.f32.xlu2 %v1528_v58  ;;  %v791_v58 = vmul.f32 %v789_v56, %v698_v8 }
 0x191   :  { %1255 = vrsqrt.f32 %v791_v58  ;;  %v1254_v1 = vpop.eup %1253  ;;  %vm798_vm0 = vweird.f32 %v791_v58 }
 0x192   :  { %v817_v4 = vmul.f32 %v1254_v1, %v815_v59  ;;  %vm823_vm12 = vweird.f32 %v1254_v1 }
 0x193   :  { %vm824_vm15 = vmor %vm822_vm14, %vm823_vm12 }
 0x194   :  { %v818_v7 = vmul.f32 %v1254_v1, %v817_v4 }
 0x196   :  { %v819_v10 = vmul.f32 0.5, %v818_v7 }
 0x197   :  { %v1256_v2 = vpop.eup %1255 }
 0x198   :  { %v793_v5 = vmul.f32 %v1256_v2, %v791_v58  ;;  %v820_v0 = vsub.f32 1.5, %v819_v10  ;;  %vm799_vm13 = vweird.f32 %v1256_v2 }
 0x199   :  { %vm800_vm1 = vmor %vm798_vm0, %vm799_vm13 }
 0x19a   :  { %v794_v9 = vmul.f32 %v1256_v2, %v793_v5  ;;  %v821_v12 = vmul.f32 %v1254_v1, %v820_v0 }
 0x19c   :  { %v795_v11 = vmul.f32 0.5, %v794_v9  ;;  %v825_v14 = vsel %vm824_vm15, %v1254_v1, %v821_v12 }
 0x19e   :  { %v796_v3 = vsub.f32 1.5, %v795_v11 }
 0x1a0   :  { %v797_v6 = vmul.f32 %v1256_v2, %v796_v3 }
 0x1a2   :  { %v801_v16 = vsel %vm800_vm1, %v1256_v2, %v797_v6 }
 0x1f4   :  { %v771_v44 = vpop.xlane.xlu0 %770 }
 0x1f5   :  { %v772_v45 = vrot.slane %v771_v44, 4 }
 0x1f7   :  { %v773_v46 = vadd.f32 %v772_v45, %v771_v44 }
 0x1f9   :  { %v774_v48 = vrot.slane %v773_v46, 2 }
 0x1fa   :  { %v727_v49 = vpop.xlane.xlu2 %726 }
 0x1fb   :  { %v728_v51 = vrot.slane %v727_v49, 4  ;;  %v775_v53 = vadd.f32 %v774_v48, %v773_v46 }
 0x1fc   :  { %v812_v8 = vpop.xlane.xlu0 %811 }
 0x1fd   :  { %v729_v52 = vadd.f32 %v728_v51, %v727_v49  ;;  %v776_v60 = vrot.slane %v775_v53, 1  ;;  %v826_v15 = vmul.f32 %v825_v14, %v812_v8 }
 0x1ff   :  { %v730_v55 = vrot.slane %v729_v52, 2  ;;  %v777_v63 = vadd.f32 %v776_v60, %v775_v53  ;;  %v1167_v18 = vadd.f32 -0.2, %v826_v15 }
 0x201   :  { %v731_v57 = vadd.f32 %v730_v55, %v729_v52  ;;  %v828_v20 = vmul.f32 5.0, %v1167_v18 }
 0x202   :  { %v782_v13 = vpop.xlane.xlu2 %781 }
 0x203   :  { %v732_v61 = vrot.slane %v731_v57, 1  ;;  %v802_v17 = vmul.f32 %v801_v16, %v782_v13  ;;  %v829_v22 = vmul.f32 1.442695, %v828_v20 }
 0x205   :  { %v733_v62 = vadd.f32 %v732_v61, %v731_v57  ;;  %v1166_v19 = vadd.f32 -0.2, %v802_v17  ;;  %1257 = vpow2.f32 %v829_v22 }
 0x207   :  { %1232 = vpush %v733_v62  ;;  %v804_v21 = vmul.f32 5.0, %v1166_v19 }
 0x208   :  { %1234 = vpush %v777_v63 }
 0x209   :  { %v805_v23 = vmul.f32 1.442695, %v804_v21 }
 0x20b   :  { %1259 = vpow2.f32 %v805_v23  ;;  %v1258_v24 = vpop.eup %1257 }
 0x211   :  { %v1260_v25 = vpop.eup %1259 }
 0x238   :  { %s1233_s2 = spop %1232 }
 0x239   :  { %s1235_s13 = spop %1234 }
 0x23a   :  { %s779_s14 = sadd.f32 %s1235_s13, %s1233_s2 }
 0x23c   :  { %v831_v26 = vstv %s779_s14 }
 0x23d   :  { %v832_v27 = vadd.f32 %v1260_v25, %v831_v26  ;;  %v852_v28 = vadd.f32 %v1258_v24, %v831_v26 }
 0x23f   :  { %v833_v29 = vadd.f32 1e-06, %v832_v27  ;;  %v853_v30 = vadd.f32 1e-06, %v852_v28 }
 0x241   :  { %1261 = vrcp.f32 %v833_v29  ;;  %v845_v37 = vand.u32 2147483648, %v833_v29  ;;  %v843_v39 = vand.u32 2147483647, %v833_v29  ;;  %v865_v40 = vand.u32 2147483648, %v853_v30 }
 0x242   :  { %1263 = vrcp.f32 %v853_v30  ;;  %v863_v42 = vand.u32 2147483647, %v853_v30  ;;  %vm839_vm4 = vweird.f32 %v833_v29  ;;  %vm859_vm6 = vweird.f32 %v853_v30 }
 0x243   :  { %v846_v44 = vor.u32 1.1754944e-38, %v845_v37  ;;  %vm844_vm7 = vcmp.eq.f32.partialorder %v843_v39, 8.507059e+37  ;;  %v866_v47 = vor.u32 1.1754944e-38, %v865_v40 }
 0x244   :  { %vm864_vm9 = vcmp.eq.f32.partialorder %v863_v42, 8.507059e+37 }
 0x247   :  { %v1262_v31 = vpop.eup %1261 }
 0x248   :  { %v1264_v32 = vpop.eup %1263  ;;  %v835_v33 = vmul.f32 %v1262_v31, %v833_v29  ;;  %vm840_vm2 = vweird.f32 %v1262_v31 }
 0x249   :  { %v855_v34 = vmul.f32 %v1264_v32, %v853_v30  ;;  %vm860_vm3 = vweird.f32 %v1264_v32  ;;  %vm841_vm5 = vmor %vm839_vm4, %vm840_vm2 }
 0x24a   :  { %v836_v35 = vsub.f32 1.0, %v835_v33  ;;  %vm861_vm8 = vmor %vm859_vm6, %vm860_vm3 }
 0x24b   :  { %v856_v36 = vsub.f32 1.0, %v855_v34 }
 0x24c   :  { %v837_v38 = vmul.f32 %v1262_v31, %v836_v35 }
 0x24d   :  { %v857_v41 = vmul.f32 %v1264_v32, %v856_v36 }
 0x24e   :  { %v838_v43 = vadd.f32 %v1262_v31, %v837_v38 }
 0x24f   :  { %v858_v45 = vadd.f32 %v1264_v32, %v857_v41 }
 0x250   :  { %v842_v46 = vsel %vm841_vm5, %v1262_v31, %v838_v43 }
 0x251   :  { %v847_v48 = vsel %vm844_vm7, %v846_v44, %v842_v46  ;;  %v862_v49 = vsel %vm861_vm8, %v1264_v32, %v858_v45 }
 0x252   :  { %v848_v50 = vmul.f32 %v1260_v25, %v847_v48  ;;  %v867_v51 = vsel %vm864_vm9, %v866_v47, %v862_v49 }
 0x253   :  { %v868_v52 = vmul.f32 %v1258_v24, %v867_v51 }
 0x254   :  { %1265 = vlog2.f32 %v848_v50 }
 0x255   :  { %1267 = vlog2.f32 %v868_v52 }
 0x25a   :  { %v1266_v53 = vpop.eup %1265 }
 0x25b   :  { %v1268_v54 = vpop.eup %1267  ;;  %v850_v55 = vmul.f32 0.6931472, %v1266_v53 }
 0x25c   :  { %v870_v56 = vmul.f32 0.6931472, %v1268_v54 }
 0x25d   :  { %v851_v57 = vsub.f32 0.0, %v850_v55 }
 0x25e   :  { %v872_v60 = vrot.slane %v870_v56, 2 }
 0x260   :  { %v874_v59 = vsub.f32 %v851_v57, %v872_v60 }
 0x262   :  { %v876_v61 = vrot.slane %v874_v59, 4 }
 0x264   :  { %v878_v58 = vsel %vm724_vm11, %v876_v61, 0.0 }
 0x265   :  { %879 = vadd.xlane.f32.xlu1 %v878_v58 }
 0x2d8   :  { %v880_v62 = vpop.xlane.xlu1 %879 }
 0x2d9   :  { %v881_v63 = vrot.slane %v880_v62, 4 }
 0x2db   :  { %v882_v1 = vadd.f32 %v881_v63, %v880_v62 }
 0x2dd   :  { %v883_v2 = vrot.slane %v882_v1, 2 }
 0x2df   :  { %v884_v4 = vadd.f32 %v883_v2, %v882_v1 }
 0x2e1   :  { %v885_v5 = vrot.slane %v884_v4, 1 }
 0x2e3   :  { %v886_v7 = vadd.f32 %v885_v5, %v884_v4 }
 0x2e5   :  { %1236 = vpush %v886_v7 }
 0x316   :  { %s1237_s20 = spop %1236 }
 0x317   :  { %v888_v9 = vstv %s1237_s20 }
 0x318   :  { %v889_v10 = vmul.f32 0.25, %v888_v9 }
 0x31a   :  { %891 = vst.msk [vmem:[#allocation3] sm:$0x1] %vm890_vm10, %v889_v10 }
 0x31b   :  { %902 = dma.vmem_to_hbm [thread:$0]  %s898_s16, 16, %s900_s19, [#allocation4]  }
 0x31c   :  { %1293 = dma.done.wait [#allocation4], 16  }
 0x31d   :  { %1294 = vsyncadd [#allocation4], 4294967280 }
 0x31e   :  { %907 = vsyncpa [#allocation4], 1 }

</bundles_post_ra>
